<compile_context>
chip_gen: v6e
topology: v6e:2x2x1
jax: 0.10.0
libtpu: 0.0.40
codegen_flags: <defaults>
</compile_context>

<pallas_src>
import math
import jax
import jax.numpy as jnp
from jax.experimental import pallas as pl
from jax.experimental.pallas import tpu as pltpu

D_MODEL = 32
D_FFN = 2048
LANE = 128   # TPU lane width; W2/b2/output are padded to this many columns.


def _round_up(x, m):
    return (x + m - 1) // m * m


def ffn_kernel(x_ref, w1_ref, b1_ref, w2_ref, b2_ref, o_ref):
    """Whole FFN for one row-tile:  out = relu(x @ W1 + b1) @ W2p + b2p.

    x_ref:  (TM, d_model)   bf16
    w1_ref: (d_model, d_ffn) bf16 (VMEM resident)
    b1_ref: (1, d_ffn)       bf16
    w2_ref: (d_ffn, 128)     bf16 (zero-padded columns, VMEM resident)
    b2_ref: (1, 128)         f32  (zero-padded columns)
    o_ref:  (TM, 128)        out_dtype (lane-dense stores)
    """
    h = jnp.dot(x_ref[...], w1_ref[...], preferred_element_type=jnp.float32)
    # bf16 bias+ReLU epilogue (2x VPU throughput on v6e/v7x); feeds the MXU directly.
    h = jnp.maximum(h.astype(jnp.bfloat16) + b1_ref[...], 0.0)
    # TODO(synk): dropout is identity here (inference mode); training-mode dropout
    # would build a keep-mask via pltpu.prng_seed / pltpu.prng_random_bits and
    # scale by 1/(1-p).
    o_ref[...] = (
        jnp.dot(h, w2_ref[...], preferred_element_type=jnp.float32) + b2_ref[...]
    ).astype(o_ref.dtype)


def prepare_params(w1_t, b1, w2, b2):
    """One-time weight prep (do this OUTSIDE the jit'd hot path):
    bf16 casts + zero lane-padding of W2/b2 to 128 columns for lane-dense stores."""
    d_ffn, d_model = w2.shape
    pad = LANE - d_model
    w1_b = w1_t.astype(jnp.bfloat16)                                   # (d_model, d_ffn)
    b1_b = b1.reshape(1, d_ffn).astype(jnp.bfloat16)                   # (1, d_ffn)
    w2_p = jnp.pad(w2, ((0, 0), (0, pad))).astype(jnp.bfloat16)        # (d_ffn, 128), zero cols
    b2_p = jnp.pad(b2.reshape(1, d_model), ((0, 0), (0, pad)))         # (1, 128) f32, zero cols
    return w1_b, b1_b, w2_p, b2_p


def feed_forward(x, w1_b, b1_b, w2_p, b2_p, *, tm=512, out_dtype=jnp.float32):
    """x: (batch, seq, d_model). Weights already prepared via prepare_params()."""
    batch, seq, d_model = x.shape
    d_ffn = w1_b.shape[1]
    lane = w2_p.shape[1]
    M = batch * seq

    # Row tile: multiple of 8, capped at tm, and (once M > 8) chosen so the
    # parallel grid axis has >= 2 steps -> both TensorCores busy on v7x.
    half = _round_up(pl.cdiv(M, 2), 8) if M > 8 else _round_up(max(M, 1), 8)
    TM = min(tm, half)
    grid = (pl.cdiv(M, TM),)   # ragged last block handled by Pallas (masked writes)

    x2d = x.reshape(M, d_model).astype(jnp.bfloat16)

    out_itemsize = jnp.dtype(out_dtype).itemsize
    cost = pl.CostEstimate(
        flops=4 * M * d_model * d_ffn,
        transcendentals=0,
        bytes_accessed=(x2d.size * 2 + w1_b.size * 2 + b1_b.size * 2
                        + w2_p.size * 2 + b2_p.size * 4 + M * lane * out_itemsize),
    )

    out_p = pl.pallas_call(
        ffn_kernel,
        out_shape=jax.ShapeDtypeStruct((M, lane), out_dtype),
        grid_spec=pltpu.PrefetchScalarGridSpec(
            num_scalar_prefetch=0,
            grid=grid,
            in_specs=[
                pl.BlockSpec((TM, d_model), lambda i: (i, 0)),      # x row tile
                pl.BlockSpec((d_model, d_ffn), lambda i: (0, 0)),   # W1^T (resident)
                pl.BlockSpec((1, d_ffn), lambda i: (0, 0)),         # b1   (resident)
                pl.BlockSpec((d_ffn, lane), lambda i: (0, 0)),      # W2 padded (resident)
                pl.BlockSpec((1, lane), lambda i: (0, 0)),          # b2 padded (resident)
            ],
            out_specs=pl.BlockSpec((TM, lane), lambda i: (i, 0)),   # lane-dense output
        ),
        compiler_params=pltpu.CompilerParams(
            dimension_semantics=("parallel",),
        ),
        cost_estimate=cost,
    )(x2d, w1_b, b1_b, w2_p, b2_p)

    # Drop the zero-padded lanes (pad columns of W2/b2 are zero, so this is exact).
    return out_p[:, :d_model].reshape(batch, seq, d_model)


def init_params(key, d_model=D_MODEL, d_ffn=D_FFN):
    """Deterministic init mirroring nn.Linear's uniform(-1/sqrt(fan_in), +)."""
    k1, k2, k3, k4 = jax.random.split(key, 4)
    bound1 = 1.0 / math.sqrt(d_model)
    bound2 = 1.0 / math.sqrt(d_ffn)
    # Store W1 transposed: (d_model, d_ffn); W2 as (d_ffn, d_model).
    w1_t = jax.random.uniform(k1, (d_model, d_ffn), jnp.float32, -bound1, bound1)
    b1 = jax.random.uniform(k2, (d_ffn,), jnp.float32, -bound1, bound1)
    w2 = jax.random.uniform(k3, (d_ffn, d_model), jnp.float32, -bound2, bound2)
    b2 = jax.random.uniform(k4, (d_model,), jnp.float32, -bound2, bound2)
    return w1_t, b1, w2, b2


def reference_f32(x, w1_t, b1, w2, b2):
    h = jnp.maximum(x @ w1_t + b1, 0.0)
    return h @ w2 + b2


def reference_bf16(x, w1_t, b1, w2, b2):
    """Same numerics as the kernel (bf16 operands + bf16 epilogue, f32 accumulation)."""
    xb = x.astype(jnp.bfloat16)
    w1b = w1_t.astype(jnp.bfloat16)
    h = jnp.dot(xb, w1b, preferred_element_type=jnp.float32)
    h = jnp.maximum(h.astype(jnp.bfloat16) + b1.astype(jnp.bfloat16), 0.0)
    w2b = w2.astype(jnp.bfloat16)
    return jnp.dot(h, w2b, preferred_element_type=jnp.float32) + b2


if __name__ == "__main__":
    key = jax.random.PRNGKey(0)
    kx, kp = jax.random.split(key)

    batch, seq = 2, 8
    x = jax.random.normal(kx, (batch, seq, D_MODEL), jnp.float32)
    w1_t, b1, w2, b2 = init_params(kp)
    params = prepare_params(w1_t, b1, w2, b2)

    out = feed_forward(x, *params)
    out = jax.block_until_ready(out)
    assert out.shape == (batch, seq, D_MODEL)

    # Tight check against a bf16-consistent reference (same matmul/epilogue numerics).
    ref_b = reference_bf16(x, w1_t, b1, w2, b2)
    assert jnp.allclose(out, ref_b, atol=2e-3, rtol=2e-3), "mismatch vs bf16 reference"

    # Loose check against the full-f32 module semantics (bf16 quantization error).
    ref_f = reference_f32(x, w1_t, b1, w2, b2)
    assert jnp.allclose(out, ref_f, atol=5e-2, rtol=5e-2), "mismatch vs f32 reference"

    print("KERNEL_OK")
</pallas_src>

<mosaic_0001>
module attributes {stable_mosaic.version = 11 : i64} {
  func.func @ffn_kernel(%arg0: i32, %arg1: memref<8x32xbf16, #tpu.memory_space<vmem>>, %arg2: memref<32x2048xbf16, #tpu.memory_space<vmem>>, %arg3: memref<1x2048xbf16, #tpu.memory_space<vmem>>, %arg4: memref<2048x128xbf16, #tpu.memory_space<vmem>>, %arg5: memref<1x128xf32, #tpu.memory_space<vmem>>, %arg6: memref<8x128xf32, #tpu.memory_space<vmem>>) attributes {dimension_semantics = [#tpu.dimension_semantics<parallel>], iteration_bounds = array<i64: 2>, scalar_prefetch = 0 : i64, scratch_operands = 0 : i64, tpu.core_type = #tpu.core_type<tc>, window_params = [{transform_indices = @transform_0, window_bounds = array<i64: 8, 32>}, {pipeline_mode = #tpu.pipeline_mode<synchronous>, transform_indices = @transform_1, window_bounds = array<i64: 32, 2048>}, {pipeline_mode = #tpu.pipeline_mode<synchronous>, transform_indices = @transform_2, window_bounds = array<i64: 1, 2048>}, {pipeline_mode = #tpu.pipeline_mode<synchronous>, transform_indices = @transform_3, window_bounds = array<i64: 2048, 128>}, {pipeline_mode = #tpu.pipeline_mode<synchronous>, transform_indices = @transform_4, window_bounds = array<i64: 1, 128>}, {transform_indices = @transform_5, window_bounds = array<i64: 8, 128>}]} {
    %c0 = arith.constant 0 : index
    %c0_0 = arith.constant 0 : index
    %0 = vector.load %arg1[%c0, %c0_0] : memref<8x32xbf16, #tpu.memory_space<vmem>>, vector<8x32xbf16>
    %c0_1 = arith.constant 0 : index
    %c0_2 = arith.constant 0 : index
    %1 = vector.load %arg2[%c0_1, %c0_2] : memref<32x2048xbf16, #tpu.memory_space<vmem>>, vector<32x2048xbf16>
    %cst = arith.constant dense<0.000000e+00> : vector<8x2048xf32>
    %2 = tpu.matmul %0, %1, %cst {dimension_numbers = #tpu.dot_dimension_numbers<[1], [0], [0], [1], [0, 0, 1, 1], [], []>} : vector<8x32xbf16>, vector<32x2048xbf16>, vector<8x2048xf32> -> vector<8x2048xf32>
    %3 = arith.truncf %2 : vector<8x2048xf32> to vector<8x2048xbf16>
    %c0_3 = arith.constant 0 : index
    %c0_4 = arith.constant 0 : index
    %4 = vector.load %arg3[%c0_3, %c0_4] : memref<1x2048xbf16, #tpu.memory_space<vmem>>, vector<1x2048xbf16>
    %5 = vector.broadcast %4 : vector<1x2048xbf16> to vector<8x2048xbf16>
    %6 = arith.addf %3, %5 : vector<8x2048xbf16>
    %cst_5 = arith.constant 0.000000e+00 : bf16
    %7 = vector.broadcast %cst_5 : bf16 to vector<8x2048xbf16>
    %8 = arith.maximumf %6, %7 : vector<8x2048xbf16>
    %c0_6 = arith.constant 0 : index
    %c0_7 = arith.constant 0 : index
    %9 = vector.load %arg4[%c0_6, %c0_7] : memref<2048x128xbf16, #tpu.memory_space<vmem>>, vector<2048x128xbf16>
    %cst_8 = arith.constant dense<0.000000e+00> : vector<8x128xf32>
    %10 = tpu.matmul %8, %9, %cst_8 {dimension_numbers = #tpu.dot_dimension_numbers<[1], [0], [0], [1], [0, 0, 1, 1], [], []>} : vector<8x2048xbf16>, vector<2048x128xbf16>, vector<8x128xf32> -> vector<8x128xf32>
    %c0_9 = arith.constant 0 : index
    %c0_10 = arith.constant 0 : index
    %11 = vector.load %arg5[%c0_9, %c0_10] : memref<1x128xf32, #tpu.memory_space<vmem>>, vector<1x128xf32>
    %12 = vector.broadcast %11 : vector<1x128xf32> to vector<8x128xf32>
    %13 = arith.addf %10, %12 : vector<8x128xf32>
    %c0_11 = arith.constant 0 : index
    %c0_12 = arith.constant 0 : index
    %14 = vector.load %arg6[%c0_11, %c0_12] : memref<8x128xf32, #tpu.memory_space<vmem>>, vector<8x128xf32>
    tpu.vector_store %arg6[%c0_11, %c0_12], %13 {strides = array<i32>} : memref<8x128xf32, #tpu.memory_space<vmem>>, vector<8x128xf32>,
    return
  }
  func.func @transform_0(%arg0: i32) -> (i32, i32) {
    %c0_i32 = arith.constant 0 : i32
    %c0_i32_0 = arith.constant 0 : i32
    return %arg0, %c0_i32 : i32, i32
  }
  func.func @transform_1(%arg0: i32) -> (i32, i32) {
    %c0_i32 = arith.constant 0 : i32
    %c0_i32_0 = arith.constant 0 : i32
    %c0_i32_1 = arith.constant 0 : i32
    return %c0_i32, %c0_i32_0 : i32, i32
  }
  func.func @transform_2(%arg0: i32) -> (i32, i32) {
    %c0_i32 = arith.constant 0 : i32
    %c0_i32_0 = arith.constant 0 : i32
    %c0_i32_1 = arith.constant 0 : i32
    return %c0_i32, %c0_i32_0 : i32, i32
  }
  func.func @transform_3(%arg0: i32) -> (i32, i32) {
    %c0_i32 = arith.constant 0 : i32
    %c0_i32_0 = arith.constant 0 : i32
    %c0_i32_1 = arith.constant 0 : i32
    return %c0_i32, %c0_i32_0 : i32, i32
  }
  func.func @transform_4(%arg0: i32) -> (i32, i32) {
    %c0_i32 = arith.constant 0 : i32
    %c0_i32_0 = arith.constant 0 : i32
    %c0_i32_1 = arith.constant 0 : i32
    return %c0_i32, %c0_i32_0 : i32, i32
  }
  func.func @transform_5(%arg0: i32) -> (i32, i32) {
    %c0_i32 = arith.constant 0 : i32
    %c0_i32_0 = arith.constant 0 : i32
    return %arg0, %c0_i32 : i32, i32
  }
}

</mosaic_0001>

<bundles_post_ra>
// kernel: tpu_custom_call.1
= control target key start
LH: loop header
LB: loop body
LE: loop exit
PB: predicated region body
PF: predicated region fallthrough
CT: control target
= control target key end

     0   :  { %10 = vsyncpa [#allocation3], 0  ;;  %s3648_s0 = inlined_call_operand.hbm [shape: bf16[16,32], index: 0, kind: input, shape index: {}]   ;;  %s3649_s1 = inlined_call_operand.hbm [shape: bf16[32,2048], index: 1, kind: input, shape index: {}]   ;;  %s3650_s2 = inlined_call_operand.hbm [shape: bf16[1,2048], index: 2, kind: input, shape index: {}]   ;;  %s3651_s3 = inlined_call_operand.hbm [shape: bf16[2048,128], index: 3, kind: input, shape index: {}]   ;;  %s3652_s4 = inlined_call_operand.vmem [shape: f32[1,128], index: 4, kind: input, shape index: {}]   ;;  %s3653_s5 = inlined_call_operand.hbm [shape: f32[16,128], index: 5, kind: output, shape index: {}]  }
   0x1   :  { %12 = vsyncpa [#allocation3 + $0x1], 0 }
   0x2   :  { %13 = vsyncpa [#allocation6], 0 }
   0x3   :  { %14 = vsyncpa [#allocation9], 0 }
   0x4   :  { %15 = vsyncpa [#allocation4], 0 }
   0x5   :  { %17 = vsyncpa [#allocation4 + $0x1], 0  ;;  %s3330_s18 = smov 0   ;;  %s3332_s19 = smov 0  }
   0x6   :  { %s3334_s20 = smov 0   ;;  %s3336_s21 = smov 0  }
   0x7 LB: > { %s3351_s22 = sadd.s32 4294967295, %s3288_s21   ;;  %s2535_s23 = sadd.s32 4294967294, %s3288_s21   ;;  %s3288_s21 = sphi %s3336_s21, %s3677_s21   ;;  %s3284_s20 = sphi %s3334_s20, %s3676_s20   ;;  %s3280_s19 = sphi %s3332_s19, %s3675_s19   ;;  %s3276_s18 = sphi %s3330_s18, %s3674_s18  }
   0x8   : > { %p43_p0 = scmp.ne.s32.totalorder %s3280_s19, %s3276_s18  ;;  %p3654_p1 = scmp.eq.s32.totalorder %s3351_s22, 0 }
   0x9   : > { %p157_p3 = scmp.eq.s32.totalorder %s2535_s23, 1  ;;  %p2536_p5 = scmp.ge.s32.totalorder %s3288_s21, 1 }
   0xa   : > { %p3360_p4 = por %p3654_p1, %p43_p0  ;;  %p164_p7 = scmp.lt.s32.totalorder %s3288_s21, 3 }
   0xb   : > { %p3365_p6 = por %p157_p3, %p43_p0  ;;  %s3290_s27 = smov [#allocation5]  }
   0xc   : > { %s3658_s24 = scalar_select %p3360_p4, 1, 0 }
   0xd   : > { %s3659_s25 = scalar_select %p3365_p6, 1, 0 }
   0xe   : > { %p3370_p8 = pnand %p2536_p5, %p164_p7  ;;  %s176_s28 = sshll.u32 %s3290_s27, 4  ;;  %s177_s28 = int_to_ptr.vmem [resolvable:$true] %s176_s28 }
   0xf   : > { %s3291_s30 = smov [#allocation7]   ;;  %s3292_s7 = smov [#allocation8]  }
  0x10   : > { %s3660_s26 = scalar_select %p3370_p8, 1, 0 }
  0x11   : > { %p2914_p9 = pneg %p3370_p8  ;;  %s190_s6 = sshll.u32 %s3291_s30, 4  ;;  %s191_s6 = int_to_ptr.vmem [resolvable:$true] %s190_s6 }
  0x12   : > { %s200_s8 = sshll.u32 %s3292_s7, 4  ;;  %s3121_s9 = scalar_lea.vmem %s177_s28, 4096  ;;  %s201_s8 = int_to_ptr.vmem [resolvable:$true] %s200_s8 }
  0x13   : > { %p3379_p11 = pnand %p2914_p9, %p3654_p1  ;;  %p3122_p13 = scmp.ne.s32.totalorder %s177_s28, %s3121_s9 }
  0x14   : > { %p3129_p5 = scmp.lt.s32.totalorder %s177_s28, %s177_s28  ;;  %p3130_p7 = scmp.lt.s32.totalorder %s3121_s9, %s3121_s9 }
  0x15   : > { %p3112_p12 = pneg %p3379_p11 }
  0x16   : > { %p3131_p9 = por %p3130_p7, %p3129_p5 }
  0x17   : > { %p3124_p0 = pnand %p3122_p13, %p3112_p12 }
  0x19   : > { %p3125_p3 = pneg %p3124_p0 }
  0x1b   : > { %p3132_p10 = pnand %p3131_p9, %p3125_p3 }
  0x1d   : > { %3135 = shalt.err (!%p3132_p10)
}
  0x1e   : > { %s3293_s10 = smov 1024   ;;  %s3294_s11 = smov 64  }
  0x1f   : > { %2917 = dma.hbm_to_vmem [thread:$0]  (!%p3379_p11), %s3649_s1, 4096, %s177_s28, [#allocation6], %s3293_s10, %s3293_s10, %s3294_s11  }
  0x20   : > { %s3147_s14 = scalar_lea.vmem %s191_s6, 256  ;;  %p3155_p2 = scmp.lt.s32.totalorder %s191_s6, %s191_s6 }
  0x21   : > { %p3148_p1 = scmp.ne.s32.totalorder %s191_s6, %s3147_s14  ;;  %p3156_p6 = scmp.lt.s32.totalorder %s3147_s14, %s3147_s14 }
  0x23   : > { %p3150_p13 = pnand %p3148_p1, %p3112_p12  ;;  %p3157_p5 = por %p3156_p6, %p3155_p2 }
  0x25   : > { %p3151_p0 = pneg %p3150_p13 }
  0x27   : > { %p3158_p3 = pnand %p3157_p5, %p3151_p0 }
  0x29   : > { %3161 = shalt.err (!%p3158_p3)
}
  0x2a   : > { %2920 = dma.hbm_to_vmem [thread:$0]  (!%p3379_p11), %s3650_s2, 256, %s191_s6, [#allocation6]  }
  0x2b   : > { %s3173_s17 = scalar_lea.vmem %s201_s8, 16384  ;;  %p3181_p9 = scmp.lt.s32.totalorder %s201_s8, %s201_s8 }
  0x2c   : > { %p3174_p10 = scmp.ne.s32.totalorder %s201_s8, %s3173_s17  ;;  %p3182_p13 = scmp.lt.s32.totalorder %s3173_s17, %s3173_s17 }
  0x2e   : > { %p3176_p7 = pnand %p3174_p10, %p3112_p12  ;;  %p3183_p4 = por %p3182_p13, %p3181_p9 }
  0x30   : > { %p3177_p1 = pneg %p3176_p7 }
  0x32   : > { %p3184_p2 = pnand %p3183_p4, %p3177_p1 }
  0x34   : > { %3187 = shalt.err (!%p3184_p2)
}
  0x35   : > { %s3295_s23 = smov 4   ;;  %s3410_s30 = sadd.s32 1, %s3288_s21  }
  0x36   : > { %2923 = dma.hbm_to_vmem [thread:$0]  (!%p3379_p11), %s3651_s3, 16384, %s201_s8, [#allocation9], %s3294_s11, %s3294_s11, %s3295_s23  }
  0x37   : > { %s27_s6 = ssub.s32 %s3288_s21, %s3410_s30  ;;  %s30_s29 = sadd.s32 1, %s3284_s20 }
  0x38   : > { %p28_p4 = scmp.eq.s32.totalorder %s27_s6, 0  ;;  %p37_p6 = scmp.ne.s32.totalorder %s3284_s20, %s3280_s19 }
  0x39   : > { %p38_p12 = scmp.eq.s32.totalorder %s3288_s21, 0  ;;  %p3662_p5 = scmp.eq.s32.totalorder %s3351_s22, 1 }
  0x3a   : > { %s3419_s7 = scalar_select %p28_p4, %s3284_s20, %s30_s29  }
  0x3b   : > { %p39_p0 = por %p38_p12, %p37_p6  ;;  %p3423_p3 = por %p3662_p5, %p37_p6 }
  0x3c   : > { %p2935_p10 = scmp.lt.s32.totalorder %s3288_s21, 2  ;;  %s217_s10 = sand.u32 1, %s3284_s20  }
  0x3d   : > { %s3663_s9 = scalar_select %p3423_p3, 1, 0 }
  0x3e   : > { %s2541_s12 = sshll.u32 %s217_s10, 2  ;;  %s2542_s8 = sshll.u32 %s3288_s21, 6 }
  0x3f   : > { %s3433_s14 = scalar_lea.hbm %s3648_s0, %s2542_s8  ;;  %s221_s15 = scalar_lea.vmem [#allocation2], %s2541_s12 }
  0x40   : > { %s228_s16 = sshll.u32 %s221_s15, 4  ;;  %p3435_p11 = pnand %p2935_p10, %p39_p0  ;;  %s229_s16 = int_to_ptr.vmem [resolvable:$true] %s228_s16 }
  0x41   : > { %s218_s23 = scalar_lea.sflag [#allocation3], %s217_s10  ;;  %s3188_s27 = scalar_lea.hbm %s3433_s14, 64 }
  0x42   : > { %p3189_p7 = scmp.ne.s32.totalorder %s3433_s14, %s3188_s27  ;;  %p3190_p1 = pneg %p3435_p11 }
  0x43   : > { %s3193_s29 = scalar_lea.hbm %s3648_s0, 128  ;;  %p3194_p2 = scmp.lt.s32.totalorder %s3433_s14, %s3648_s0 }
  0x44   : > { %p3191_p9 = pnand %p3190_p1, %p3189_p7  ;;  %p3195_p4 = scmp.lt.s32.totalorder %s3193_s29, %s3188_s27 }
  0x46   : > { %p3192_p13 = pneg %p3191_p9  ;;  %p3196_p6 = por %p3195_p4, %p3194_p2 }
  0x48   : > { %p3197_p12 = pnand %p3196_p6, %p3192_p13 }
  0x4a   : > { %3200 = shalt.err (!%p3197_p12)
}
  0x4b   : > { %s3201_s11 = scalar_lea.vmem %s229_s16, 64  ;;  %s3296_s10 = smov [#allocation2]  }
  0x4c   : > { %p3202_p0 = scmp.ne.s32.totalorder %s229_s16, %s3201_s11  ;;  %s3206_s13 = sshll.u32 %s3296_s10, 4  ;;  %s3207_s13 = int_to_ptr.vmem [resolvable:$false] %s3206_s13 }
  0x4d   : > { %s3208_s15 = scalar_lea.vmem %s3207_s13, 128  ;;  %p3209_p7 = scmp.lt.s32.totalorder %s229_s16, %s3207_s13 }
  0x4e   : > { %p3204_p5 = pnand %p3202_p0, %p3190_p1  ;;  %p3210_p9 = scmp.lt.s32.totalorder %s3208_s15, %s3201_s11 }
  0x50   : > { %p3205_p10 = pneg %p3204_p5  ;;  %p3211_p3 = por %p3210_p9, %p3209_p7 }
  0x52   : > { %p3212_p8 = pnand %p3211_p3, %p3205_p10 }
  0x54   : > { %3215 = shalt.err (!%p3212_p8)
}
  0x55   : > { %2927 = dma.hbm_to_vmem [thread:$0]  (!%p3435_p11), %s3433_s14, 64, %s229_s16, %s218_s23  }
  0x56   : > { %p3665_p13 = scmp.ne.s32.totalorder %s3660_s26, 0 }
  0x57   : > { %s3456_s27 = sand.u32 (!%p3665_p13), 1, %s3280_s19   ;;  %p3666_p1 = scmp.ne.s32.totalorder (!%p3665_p13), %s3658_s24, 0 }
  0x58   : > { %237 = sbr.rel (%p3665_p13) target bundleno = 625 (0x271), region = 40  ;;  %s2544_s28 = sshll.u32 (!%p3665_p13), %s3456_s27, 2 }
  0x59   : > { %s240_s6 = scalar_lea.sflag (!%p3665_p13), [#allocation3], %s3456_s27  ;;  %s3460_s29 = scalar_lea.vmem (!%p3665_p13), [#allocation2], %s2544_s28 }
  0x5d   : > { %3259 = dma.done.wait (%p3666_p1), %s240_s6, 64  }
  0x5e   : > { %3261 = vsyncadd (%p3666_p1), %s240_s6, 4294967232  ;;  %p3667_p8 = scmp.eq.s32.totalorder %s3351_s22, 0 }
  0x60   : > { %3263 = dma.done.wait (%p3667_p8), [#allocation6], 4352   ;;  %p3668_p3 = pmov %p3667_p8 }
  0x62   : > { %3265 = vsyncadd (%p3668_p3), [#allocation6], 4294962944  ;;  %p3669_p11 = pmov %p3668_p3 }
  0x63   : > { %p3670_p2 = pmov %p3668_p3 }
  0x64   : > { %3267 = dma.done.wait (%p3669_p11), [#allocation9], 16384  }
  0x65   : > { %3269 = vsyncadd (%p3670_p2), [#allocation9], 4294950912  ;;  %v3297_v0 = vmov 0   ;;  %v300_v1 = vld [vmem:[#allocation5 + $0x80] sm:$0xff]  ;;  %v301_v3 = vld [vmem:[#allocation5 + $0x88] sm:$0xff]  ;;  %vm476_vm0 = vcmask 261120  }
  0x66   : > { %512 = vmatprep.mubr.bf16.mxu0 %v3297_v0  ;;  %553 = vmatprep.mubr.bf16.mxu1 %v3297_v0  ;;  %v308_v2 = vld [vmem:[#allocation5 + $0xc0] sm:$0xff]  ;;  %v309_v5 = vld [vmem:[#allocation5 + $0xc8] sm:$0xff]  ;;  %v302_v15 = vld [vmem:[#allocation5 + $0x90] sm:$0xff]  ;;  %s2548_s14 = sshll.u32 %s3456_s27, 3  ;;  %s2719_s16 = sshll.u32 %s3351_s22, 7 }
  0x67   : > { %v2566_v4 = vcombine.high %v300_v1, %v308_v2  ;;  %v2565_v6 = vcombine.low %v300_v1, %v308_v2  ;;  %v284_v7 = vld [vmem:[#allocation5] sm:$0xff]  ;;  %v2568_v9 = vcombine.high %v301_v3, %v309_v5  ;;  %v2567_v10 = vcombine.low %v301_v3, %v309_v5  ;;  %v285_v12 = vld [vmem:[#allocation5 + $0x8] sm:$0xff]  ;;  %v310_v16 = vld [vmem:[#allocation5 + $0xd0] sm:$0xff]  ;;  %s281_s17 = scalar_lea.vmem [#allocation10], %s2548_s14  ;;  %s2434_s11 = scalar_lea.hbm %s3653_s5, %s2719_s16 }
  0x68   : > { %v292_v8 = vld [vmem:[#allocation5 + $0x40] sm:$0xff]  ;;  %v293_v13 = vld [vmem:[#allocation5 + $0x48] sm:$0xff]  ;;  %v303_v17 = vld [vmem:[#allocation5 + $0x98] sm:$0xff]  ;;  %v2570_v21 = vcombine.high %v302_v15, %v310_v16  ;;  %v2569_v28 = vcombine.low %v302_v15, %v310_v16  ;;  %s2436_s23 = sshll.u32 %s281_s17, 4  ;;  %s2423_s10 = scalar_lea.sflag [#allocation4], %s3456_s27  ;;  %s2437_s23 = int_to_ptr.vmem [resolvable:$true] %s2436_s23 }
  0x69   : > { %v2550_v11 = vcombine.high %v284_v7, %v292_v8  ;;  %492 = vmatprep.subr.bf16.mxu0 %v2566_v4  ;;  %v2552_v14 = vcombine.high %v285_v12, %v293_v13  ;;  %533 = vmatprep.subr.bf16.mxu1 %v2568_v9  ;;  %v2549_v18 = vcombine.low %v284_v7, %v292_v8  ;;  %v311_v19 = vld [vmem:[#allocation5 + $0xd8] sm:$0xff]  ;;  %v286_v23 = vld [vmem:[#allocation5 + $0x10] sm:$0xff]  ;;  %v304_v32 = vld [vmem:[#allocation5 + $0xa0] sm:$0xff]  ;;  %s3216_s13 = scalar_lea.vmem %s2437_s23, 128  ;;  %p3671_p6 = scmp.ne.s32.totalorder %s3663_s9, 0 }
  0x6a   : > { %493 = vmatpush1.bf16.msra.mxu0 %v2565_v6  ;;  %534 = vmatpush1.bf16.msra.mxu1 %v2567_v10  ;;  %v2551_v20 = vcombine.low %v285_v12, %v293_v13  ;;  %v2572_v22 = vcombine.high %v303_v17, %v311_v19  ;;  %v294_v24 = vld [vmem:[#allocation5 + $0x50] sm:$0xff]  ;;  %v287_v25 = vld [vmem:[#allocation5 + $0x18] sm:$0xff]  ;;  %v2571_v29 = vcombine.low %v303_v17, %v311_v19  ;;  %v312_v33 = vld [vmem:[#allocation5 + $0xe0] sm:$0xff]  ;;  %p3217_p4 = scmp.ne.s32.totalorder %s2437_s23, %s3216_s13  ;;  %s3299_s22 = smov [#allocation10]  }
  0x6b   : > { %494 = vmatprep.subr.bf16.mxu0 %v2550_v11  ;;  %535 = vmatprep.subr.bf16.mxu1 %v2552_v14  ;;  %v295_v26 = vld [vmem:[#allocation5 + $0x58] sm:$0xff]  ;;  %v2554_v30 = vcombine.high %v286_v23, %v294_v24  ;;  %v305_v34 = vld [vmem:[#allocation5 + $0xa8] sm:$0xff]  ;;  %v2553_v36 = vcombine.low %v286_v23, %v294_v24  ;;  %v288_v37 = vld [vmem:[#allocation5 + $0x20] sm:$0xff]  ;;  %v2574_v39 = vcombine.high %v304_v32, %v312_v33  ;;  %s3220_s15 = sshll.u32 %s3299_s22, 4  ;;  %s3221_s15 = int_to_ptr.vmem [resolvable:$false] %s3220_s15 }
  0x6c   : > { %v3477_v27 = vld [vmem:[%s3460_s29] sm:$0xf]  ;;  %v2556_v31 = vcombine.high %v287_v25, %v295_v26  ;;  %v313_v35 = vld [vmem:[#allocation5 + $0xe8] sm:$0xff]  ;;  %v2555_v38 = vcombine.low %v287_v25, %v295_v26  ;;  %v296_v40 = vld [vmem:[#allocation5 + $0x60] sm:$0xff]  ;;  %v2573_v44 = vcombine.low %v304_v32, %v312_v33  ;;  %p3218_p12 = pnand %p3217_p4, %p3671_p6  ;;  %s3222_s28 = scalar_lea.vmem %s3221_s15, 256 }
  0x6d   : > { %v2576_v41 = vcombine.high %v305_v34, %v313_v35  ;;  %v289_v42 = vld [vmem:[#allocation5 + $0x28] sm:$0xff]  ;;  %v306_v45 = vld [vmem:[#allocation5 + $0xb0] sm:$0xff]  ;;  %v2575_v46 = vcombine.low %v305_v34, %v313_v35  ;;  %v2558_v47 = vcombine.high %v288_v37, %v296_v40  ;;  %v307_v50 = vld [vmem:[#allocation5 + $0xb8] sm:$0xff]  ;;  %v2557_v52 = vcombine.low %v288_v37, %v296_v40  ;;  %p3223_p5 = scmp.lt.s32.totalorder %s2437_s23, %s3221_s15  ;;  %p3224_p10 = scmp.lt.s32.totalorder %s3222_s28, %s3216_s13 }
  0x6e   : > { %495 = vmatpush1.bf16.msra.mxu0 %v2549_v18  ;;  %536 = vmatpush1.bf16.msra.mxu1 %v2551_v20  ;;  %v297_v43 = vld [vmem:[#allocation5 + $0x68] sm:$0xff]  ;;  %v314_v48 = vld [vmem:[#allocation5 + $0xf0] sm:$0xff]  ;;  %v315_v51 = vld [vmem:[#allocation5 + $0xf8] sm:$0xff]  ;;  %v3298_v37 = vmov 1966171168   ;;  %p3219_p0 = pneg %p3218_p12 }
  0x6f   : > { %574 = vmatprep.subr.bf16.mxu0 %v2570_v21  ;;  %615 = vmatprep.subr.bf16.mxu1 %v2572_v22  ;;  %v2560_v49 = vcombine.high %v289_v42, %v297_v43  ;;  %v290_v53 = vld [vmem:[#allocation5 + $0x30] sm:$0xff]  ;;  %v2559_v54 = vcombine.low %v289_v42, %v297_v43  ;;  %v2578_v55 = vcombine.high %v306_v45, %v314_v48  ;;  %v291_v58 = vld [vmem:[#allocation5 + $0x38] sm:$0xff]  ;;  %v2980_v2 = vld [vmem:[#allocation8 + $0x78] sm:$0xff]   ;;  %p3225_p7 = por %p3224_p10, %p3223_p5 }
  0x70   : > { %v298_v56 = vld [vmem:[#allocation5 + $0x70] sm:$0xff]  ;;  %v2580_v57 = vcombine.high %v307_v50, %v315_v51  ;;  %v299_v59 = vld [vmem:[#allocation5 + $0x78] sm:$0xff]  ;;  %v2577_v60 = vcombine.low %v306_v45, %v314_v48  ;;  %v2579_v61 = vcombine.low %v307_v50, %v315_v51  ;;  %v2981_v4 = vld [vmem:[#allocation8 + $0xf8] sm:$0xff]  }
  0x71   : > { %2581 = vmatmul.mubr.msk.bf16.vlgmr.msra.gmra.mxu0 %vm476_vm0, %v3477_v27  ;;  %2582 = vmatmul.mubr.msk.bf16.vlgmr.msra.gmra.mxu1 %vm476_vm0, %v3477_v27  ;;  %v2562_v62 = vcombine.high %v290_v53, %v298_v56  ;;  %v2564_v63 = vcombine.high %v291_v58, %v299_v59  ;;  %v2561_v1 = vcombine.low %v290_v53, %v298_v56  ;;  %v2982_v5 = vld [vmem:[#allocation8 + $0x38] sm:$0xff]   ;;  %v2984_v7 = vld [vmem:[#allocation8 + $0x70] sm:$0xff]   ;;  %v2988_v11 = vld [vmem:[#allocation8 + $0x68] sm:$0xff]   ;;  %p3226_p9 = pnand %p3225_p7, %p3219_p0 }
  0x72   : > { %575 = vmatpush1.bf16.msra.mxu0 %v2569_v28  ;;  %616 = vmatpush1.bf16.msra.mxu1 %v2571_v29  ;;  %v2563_v3 = vcombine.low %v291_v58, %v299_v59  ;;  %v2983_v6 = vld [vmem:[#allocation8 + $0xb8] sm:$0xff]   ;;  %v2985_v8 = vld [vmem:[#allocation8 + $0xf0] sm:$0xff]   ;;  %v2989_v12 = vld [vmem:[#allocation8 + $0xe8] sm:$0xff]  }
  0x73   : > { %576 = vmatprep.subr.bf16.mxu0 %v2554_v30  ;;  %617 = vmatprep.subr.bf16.mxu1 %v2556_v31  ;;  %v2986_v9 = vld [vmem:[#allocation8 + $0x30] sm:$0xff]   ;;  %v2990_v13 = vld [vmem:[#allocation8 + $0x28] sm:$0xff]   ;;  %v2992_v15 = vld [vmem:[#allocation8 + $0x60] sm:$0xff]  }
  0x74   : > { %594 = vmatprep.mubr.bf16.mxu0 %v3297_v0  ;;  %635 = vmatprep.mubr.bf16.mxu1 %v3297_v0  ;;  %v2987_v10 = vld [vmem:[#allocation8 + $0xb0] sm:$0xff]   ;;  %v2991_v14 = vld [vmem:[#allocation8 + $0xa8] sm:$0xff]   ;;  %v2993_v16 = vld [vmem:[#allocation8 + $0xe0] sm:$0xff]  }
  0x75   : > { %v2994_v17 = vld [vmem:[#allocation8 + $0x20] sm:$0xff]   ;;  %v2996_v19 = vld [vmem:[#allocation8 + $0x58] sm:$0xff]   ;;  %v3000_v23 = vld [vmem:[#allocation8 + $0x50] sm:$0xff]  }
  0x76   : > { %577 = vmatpush1.bf16.msra.mxu0 %v2553_v36  ;;  %618 = vmatpush1.bf16.msra.mxu1 %v2555_v38  ;;  %v2995_v18 = vld [vmem:[#allocation8 + $0xa0] sm:$0xff]   ;;  %v2997_v20 = vld [vmem:[#allocation8 + $0xd8] sm:$0xff]   ;;  %v3001_v24 = vld [vmem:[#allocation8 + $0xd0] sm:$0xff]   ;;  %v830_v38 = vunpack.c.l.s4 %v3298_v37 }
  0x77   : > { %656 = vmatprep.subr.bf16.mxu0 %v2574_v39  ;;  %697 = vmatprep.subr.bf16.mxu1 %v2576_v41  ;;  %v2998_v21 = vld [vmem:[#allocation8 + $0x18] sm:$0xff]   ;;  %v3002_v25 = vld [vmem:[#allocation8 + $0x10] sm:$0xff]   ;;  %v3005_v28 = vld [vmem:[#allocation8 + $0xc8] sm:$0xff]   ;;  %v832_v39 = vlaneseq }
  0x78   : > { %v2999_v22 = vld [vmem:[#allocation8 + $0x98] sm:$0xff]   ;;  %v3003_v26 = vld [vmem:[#allocation8 + $0x90] sm:$0xff]   ;;  %v3006_v29 = vld [vmem:[#allocation8 + $0x8] sm:$0xff]   ;;  %v831_v40 = vunpack.c.0.s8 %v830_v38 }
  0x79   : > { %2583 = vmatmul.mubr.msk.bf16.vlgmr.msra.gmra.mxu0 %vm476_vm0, %v3477_v27  ;;  %2584 = vmatmul.mubr.msk.bf16.vlgmr.msra.gmra.mxu1 %vm476_vm0, %v3477_v27  ;;  %v3007_v30 = vld [vmem:[#allocation8 + $0x88] sm:$0xff]   ;;  %v3008_v31 = vld [vmem:[#allocation8 + $0x40] sm:$0xff]   ;;  %v3012_v35 = vld [vmem:[#allocation8 + $0x178] sm:$0xff]   ;;  %v833_v41 = vshrl.u32 %v832_v39, 7 }
  0x7a   : > { %657 = vmatpush1.bf16.msra.mxu0 %v2573_v44  ;;  %698 = vmatpush1.bf16.msra.mxu1 %v2575_v46  ;;  %v3009_v32 = vld [vmem:[#allocation8 + $0xc0] sm:$0xff]   ;;  %v3013_v36 = vld [vmem:[#allocation8 + $0x1f8] sm:$0xff]   ;;  %v824_v43 = vld [vmem:[#allocation7] sm:$0xff] }
  0x7b   : > { %658 = vmatprep.subr.bf16.mxu0 %v2558_v47  ;;  %699 = vmatprep.subr.bf16.mxu1 %v2560_v49  ;;  %v3010_v33 = vld [vmem:[#allocation8] sm:$0xff]   ;;  %v3501_v42 = vsub.s32 %v831_v40, %v833_v41  ;;  %v828_v46 = vcombine.high %v824_v43, %v824_v43  ;;  %v3020_v37 = vld [vmem:[#allocation8 + $0x168] sm:$0xff]  }
  0x7c   : > { %676 = vmatprep.mubr.bf16.mxu0 %v3297_v0  ;;  %717 = vmatprep.mubr.bf16.mxu1 %v3297_v0  ;;  %v3011_v34 = vld [vmem:[#allocation8 + $0x80] sm:$0xff]   ;;  %v3021_v40 = vld [vmem:[#allocation8 + $0x1e8] sm:$0xff]  }
  0x7d   : > { %v835_v44 = vrot.slane %v824_v43, %v3501_v42  ;;  %v3507_v49 = vrot.slane %v828_v46, %v3501_v42 }
  0x7e   : > { %659 = vmatpush1.bf16.msra.mxu0 %v2557_v52  ;;  %700 = vmatpush1.bf16.msra.mxu1 %v2559_v54  ;;  %v3511_v54 = vsub.s32 0, %v833_v41 }
  0x7f   : > { %738 = vmatprep.subr.bf16.mxu0 %v2578_v55  ;;  %779 = vmatprep.subr.bf16.mxu1 %v2580_v57  ;;  %v843_v45 = vcombine.high %v835_v44, %v835_v44  ;;  %v851_v47 = vrot.slane %v835_v44, %v3501_v42  ;;  %v844_v52 = vcombine.high %v3507_v49, %v3507_v49 }
  0x81   : > { %2585 = vmatmul.mubr.msk.bf16.vlgmr.msra.gmra.mxu0 %vm476_vm0, %v3477_v27  ;;  %2586 = vmatmul.mubr.msk.bf16.vlgmr.msra.gmra.mxu1 %vm476_vm0, %v3477_v27  ;;  %v865_v48 = vrot.slane %v843_v45, %v3501_v42  ;;  %v873_v50 = vcombine.high %v851_v47, %v851_v47  ;;  %v927_v53 = vpack.i.b16 %v851_v47, %v851_v47  ;;  %v3022_v47 = vld [vmem:[#allocation8 + $0x128] sm:$0xff]  }
  0x82   : > { %739 = vmatpush1.bf16.msra.mxu0 %v2577_v60  ;;  %780 = vmatpush1.bf16.msra.mxu1 %v2579_v61  ;;  %v872_v58 = vrot.slane %v844_v52, %v3501_v42  ;;  %v3024_v52 = vld [vmem:[#allocation8 + $0x160] sm:$0xff]  }
  0x83   : > { %740 = vmatprep.subr.bf16.mxu0 %v2562_v62  ;;  %781 = vmatprep.subr.bf16.mxu1 %v2564_v63  ;;  %v875_v51 = vcombine.high %v865_v48, %v865_v48  ;;  %v941_v55 = vpack.i.b16 %v873_v50, %v873_v50  ;;  %v934_v56 = vpack.i.b16 %v865_v48, %v865_v48 }
  0x84   : > { %758 = vmatprep.mubr.bf16.mxu0 %v3297_v0  ;;  %799 = vmatprep.mubr.bf16.mxu1 %v3297_v0  ;;  %v932_v60 = vrot.slane %v927_v53, %v3511_v54 }
  0x85   : > { %v948_v57 = vpack.i.b16 %v875_v51, %v875_v51  ;;  %v946_v61 = vrot.slane %v941_v55, %v3511_v54  ;;  %v3023_v51 = vld [vmem:[#allocation8 + $0x1a8] sm:$0xff]  }
  0x86   : > { %741 = vmatpush1.bf16.msra.mxu0 %v2561_v1  ;;  %782 = vmatpush1.bf16.msra.mxu1 %v2563_v3  ;;  %v939_v1 = vrot.slane %v934_v56, %v3511_v54  ;;  %v3025_v56 = vld [vmem:[#allocation8 + $0x1e0] sm:$0xff]  }
  0x87   : > { %2722 = vmatprep.subr.bf16.mxu0 %v2980_v2  ;;  %2744 = vmatprep.subr.bf16.mxu1 %v2981_v4  ;;  %v953_v4 = vrot.slane %v948_v57, %v3511_v54 }
  0x89   : > { %2587 = vmatmul.mubr.msk.bf16.vlgmr.msra.gmra.mxu0 %vm476_vm0, %v3477_v27  ;;  %2588 = vmatmul.mubr.msk.bf16.vlgmr.msra.gmra.mxu1 %vm476_vm0, %v3477_v27  ;;  %v3004_v27 = vld [vmem:[#allocation8 + $0x48] sm:$0xff]  }
  0x8a   : > { %2723 = vmatpush3.bf16.msra.mxu0 %v2982_v5  ;;  %2745 = vmatpush3.bf16.msra.mxu1 %v2983_v6  ;;  %v876_v5 = vcombine.high %v872_v58, %v872_v58 }
  0x8b   : > { %2724 = vmatprep.subr.bf16.mxu0 %v2984_v7  ;;  %2746 = vmatprep.subr.bf16.mxu1 %v2985_v8 }
  0x8e   : > { %2725 = vmatpush3.bf16.msra.mxu0 %v2986_v9  ;;  %2747 = vmatpush3.bf16.msra.mxu1 %v2987_v10 }
  0x8f   : > { %2726 = vmatprep.subr.bf16.mxu0 %v2988_v11  ;;  %2748 = vmatprep.subr.bf16.mxu1 %v2989_v12 }
  0x92   : > { %2727 = vmatpush3.bf16.msra.mxu0 %v2990_v13  ;;  %2749 = vmatpush3.bf16.msra.mxu1 %v2991_v14  ;;  %v962_v14 = vpack.i.b16 %v872_v58, %v872_v58 }
  0x93   : > { %2728 = vmatprep.subr.bf16.mxu0 %v2992_v15  ;;  %2750 = vmatprep.subr.bf16.mxu1 %v2993_v16 }
  0x96   : > { %2729 = vmatpush3.bf16.msra.mxu0 %v2994_v17  ;;  %2751 = vmatpush3.bf16.msra.mxu1 %v2995_v18  ;;  %v976_v17 = vpack.i.b16 %v876_v5, %v876_v5 }
  0x97   : > { %2730 = vmatprep.subr.bf16.mxu0 %v2996_v19  ;;  %2752 = vmatprep.subr.bf16.mxu1 %v2997_v20 }
  0x9a   : > { %2731 = vmatpush3.bf16.msra.mxu0 %v2998_v21  ;;  %2753 = vmatpush3.bf16.msra.mxu1 %v2999_v22  ;;  %v3014_v21 = vld [vmem:[#allocation8 + $0x138] sm:$0xff]  }
  0x9b   : > { %2732 = vmatprep.subr.bf16.mxu0 %v3000_v23  ;;  %2754 = vmatprep.subr.bf16.mxu1 %v3001_v24  ;;  %v3015_v24 = vld [vmem:[#allocation8 + $0x1b8] sm:$0xff]  }
  0x9e   : > { %2733 = vmatpush3.bf16.msra.mxu0 %v3002_v25  ;;  %2755 = vmatpush3.bf16.msra.mxu1 %v3003_v26  ;;  %v3016_v25 = vld [vmem:[#allocation8 + $0x170] sm:$0xff]  }
  0x9f   : > { %2734 = vmatprep.subr.bf16.mxu0 %v3004_v27  ;;  %2756 = vmatprep.subr.bf16.mxu1 %v3005_v28  ;;  %v3017_v27 = vld [vmem:[#allocation8 + $0x1f0] sm:$0xff]   ;;  %v967_v28 = vrot.slane %v962_v14, %v3511_v54 }
  0xa2   : > { %2735 = vmatpush3.bf16.msra.mxu0 %v3006_v29  ;;  %2757 = vmatpush3.bf16.msra.mxu1 %v3007_v30 }
  0xa3   : > { %2736 = vmatprep.subr.bf16.mxu0 %v3008_v31  ;;  %2758 = vmatprep.subr.bf16.mxu1 %v3009_v32  ;;  %v981_v31 = vrot.slane %v976_v17, %v3511_v54  ;;  %v3018_v32 = vld [vmem:[#allocation8 + $0x130] sm:$0xff]  }
  0xa4   : > { %v3035_v17 = vld [vmem:[#allocation8 + $0x110] sm:$0xff]  }
  0xa6   : > { %2737 = vmatpush3.bf16.msra.mxu0 %v3010_v33  ;;  %2759 = vmatpush3.bf16.msra.mxu1 %v3011_v34 }
  0xa7   : > { %2766 = vmatprep.subr.bf16.mxu0 %v3012_v35  ;;  %2788 = vmatprep.subr.bf16.mxu1 %v3013_v36  ;;  %v3528_v35 = vld [vmem:[#allocation7 + $0x8] sm:$0xff]  ;;  %v3019_v36 = vld [vmem:[#allocation8 + $0x1b0] sm:$0xff]  }
  0xa8   : > { %v3532_v46 = vrot.slane %v3528_v35, %v3501_v42 }
 0x131   : > { %v514_v59 = vpop.f32.mrf.mxu0  ;;  %v555_v63 = vpop.f32.mrf.mxu1 }
 0x132   : > { %v808_v62 = vpack.c.bf16 %v514_v59, %v514_v59  ;;  %v810_v2 = vpack.c.bf16 %v555_v63, %v555_v63  ;;  %v892_v59 = vcombine.high %v3532_v46, %v3532_v46  ;;  %v3027_v63 = vld [vmem:[#allocation8 + $0x1a0] sm:$0xff]  }
 0x133   : > { %v516_v3 = vpop.f32.mrf.mxu0  ;;  %v557_v7 = vpop.f32.mrf.mxu1 }
 0x134   : > { %v809_v6 = vpack.c.bf16 %v516_v3, %v516_v3  ;;  %v1038_v8 = vadd.bf16 %v932_v60, %v808_v62  ;;  %v1040_v9 = vadd.bf16 %v946_v61, %v810_v2  ;;  %v811_v10 = vpack.c.bf16 %v557_v7, %v557_v7  ;;  %v3026_v60 = vld [vmem:[#allocation8 + $0x120] sm:$0xff]   ;;  %v3029_v3 = vld [vmem:[#allocation8 + $0x1d8] sm:$0xff]  }
 0x135   : > { %v518_v11 = vpop.f32.mrf.mxu0  ;;  %v559_v13 = vpop.f32.mrf.mxu1  ;;  %v858_v61 = vrot.slane %v3507_v49, %v3501_v42  ;;  %v914_v5 = vrot.slane %v892_v59, %v3501_v42  ;;  %v3031_v7 = vld [vmem:[#allocation8 + $0x118] sm:$0xff]  }
 0x136   : > { %v1039_v12 = vadd.bf16 %v939_v1, %v809_v6  ;;  %v1041_v15 = vadd.bf16 %v953_v4, %v811_v10  ;;  %v1056_v18 = vmax.bf16 %v3297_v0, %v1040_v9  ;;  %v1054_v22 = vmax.bf16 %v3297_v0, %v1038_v8  ;;  %v3028_v1 = vld [vmem:[#allocation8 + $0x158] sm:$0xff]   ;;  %v3033_v10 = vld [vmem:[#allocation8 + $0x150] sm:$0xff]  }
 0x137   : > { %v519_v16 = vpop.f32.mrf.mxu0  ;;  %v560_v19 = vpop.f32.mrf.mxu1  ;;  %v874_v8 = vcombine.high %v858_v61, %v858_v61  ;;  %v3032_v49 = vld [vmem:[#allocation8 + $0x198] sm:$0xff]   ;;  %v924_v14 = vcombine.high %v914_v5, %v914_v5 }
 0x138   : > { %v1055_v20 = vmax.bf16 %v3297_v0, %v1039_v12  ;;  %v1057_v23 = vmax.bf16 %v3297_v0, %v1041_v15  ;;  %v3034_v12 = vld [vmem:[#allocation8 + $0x1d0] sm:$0xff]   ;;  %v955_v19 = vpack.i.b16 %v858_v61, %v858_v61  ;;  %v3048_v59 = vld [vmem:[#allocation8 + $0x2b8] sm:$0xff]  }
 0x139   : > { %v3522_v26 = vpop.f32.mrf.mxu0  ;;  %v3525_v29 = vpop.f32.mrf.mxu1  ;;  %v969_v16 = vpack.i.b16 %v874_v8, %v874_v8  ;;  %v3050_v61 = vld [vmem:[#allocation8 + $0x2f0] sm:$0xff]   ;;  %v3056_v8 = vld [vmem:[#allocation8 + $0x2a8] sm:$0xff]  }
 0x13a   : > { %2133 = vmatprep.mubr.bf16.mxu0 %v1055_v20  ;;  %2173 = vmatprep.mubr.bf16.mxu1 %v1057_v23  ;;  %v3036_v20 = vld [vmem:[#allocation8 + $0x190] sm:$0xff]   ;;  %v3038_v23 = vld [vmem:[#allocation8 + $0x1c8] sm:$0xff]  }
 0x13b   : > { %2134 = vmatmul.mubr.bf16.vlgmr.msra.gmra.mxu0 %v1054_v22  ;;  %v598_v30 = vpop.f32.mrf.mxu0  ;;  %2174 = vmatmul.mubr.bf16.vlgmr.msra.gmra.mxu1 %v1056_v18  ;;  %v639_v34 = vpop.f32.mrf.mxu1 }
 0x13c   : > { %2767 = vmatpush3.bf16.msra.mxu0 %v3014_v21  ;;  %v813_v33 = vpack.c.bf16 %v598_v30, %v598_v30  ;;  %2789 = vmatpush3.bf16.msra.mxu1 %v3015_v24  ;;  %v815_v39 = vpack.c.bf16 %v639_v34, %v639_v34  ;;  %v3037_v21 = vld [vmem:[#allocation8 + $0x148] sm:$0xff]   ;;  %v990_v24 = vpack.i.b16 %v914_v5, %v914_v5 }
 0x13d   : > { %2768 = vmatprep.subr.bf16.mxu0 %v3016_v25  ;;  %v600_v38 = vpop.f32.mrf.mxu0  ;;  %2790 = vmatprep.subr.bf16.mxu1 %v3017_v27  ;;  %v641_v43 = vpop.f32.mrf.mxu1  ;;  %v1004_v27 = vpack.i.b16 %v924_v14, %v924_v14  ;;  %v814_v30 = vpack.c.bf16 %v3525_v29, %v3525_v29  ;;  %v812_v34 = vpack.c.bf16 %v3522_v26, %v3522_v26  ;;  %v3043_v26 = vld [vmem:[#allocation8 + $0x100] sm:$0xff]   ;;  %v3054_v5 = vld [vmem:[#allocation8 + $0x2e8] sm:$0xff]  }
 0x13e   : > { %v1043_v41 = vadd.bf16 %v967_v28, %v813_v33  ;;  %v1045_v44 = vadd.bf16 %v981_v31, %v815_v39  ;;  %v974_v31 = vrot.slane %v969_v16, %v3511_v54  ;;  %v3041_v38 = vld [vmem:[#allocation8 + $0x140] sm:$0xff]   ;;  %v995_v29 = vrot.slane %v990_v24, %v3511_v54  ;;  %v3061_v16 = vld [vmem:[#allocation8 + $0x258] sm:$0xff]   ;;  %v3066_v24 = vld [vmem:[#allocation8 + $0x2d0] sm:$0xff]  }
 0x13f   : > { %v601_v45 = vpop.f32.mrf.mxu0  ;;  %v642_v48 = vpop.f32.mrf.mxu1  ;;  %v3042_v39 = vld [vmem:[#allocation8 + $0x1c0] sm:$0xff]   ;;  %v1009_v43 = vrot.slane %v1004_v27, %v3511_v54  ;;  %v3067_v27 = vld [vmem:[#allocation8 + $0x210] sm:$0xff]  }
 0x140   : > { %2769 = vmatpush3.bf16.msra.mxu0 %v3018_v32  ;;  %v1059_v50 = vmax.bf16 %v3297_v0, %v1043_v41  ;;  %2791 = vmatpush3.bf16.msra.mxu1 %v3019_v36  ;;  %v1061_v53 = vmax.bf16 %v3297_v0, %v1045_v44  ;;  %v3039_v32 = vld [vmem:[#allocation8 + $0x108] sm:$0xff]   ;;  %v960_v36 = vrot.slane %v955_v19, %v3511_v54  ;;  %v3045_v48 = vld [vmem:[#allocation8 + $0x278] sm:$0xff]   ;;  %v3060_v14 = vld [vmem:[#allocation8 + $0x2a0] sm:$0xff]  }
 0x141   : > { %2770 = vmatprep.subr.bf16.mxu0 %v3020_v37  ;;  %v3536_v55 = vpop.f32.mrf.mxu0  ;;  %2792 = vmatprep.subr.bf16.mxu1 %v3021_v40  ;;  %v3538_v57 = vpop.f32.mrf.mxu1  ;;  %v3040_v37 = vld [vmem:[#allocation8 + $0x188] sm:$0xff]   ;;  %v1044_v44 = vadd.bf16 %v974_v31, %v814_v30  ;;  %v3068_v30 = vld [vmem:[#allocation8 + $0x290] sm:$0xff]  }
 0x142   : > { %2213 = vmatprep.mubr.bf16.mxu0 %v1059_v50  ;;  %2253 = vmatprep.mubr.bf16.mxu1 %v1061_v53  ;;  %v1042_v45 = vadd.bf16 %v960_v36, %v812_v34  ;;  %v3046_v50 = vld [vmem:[#allocation8 + $0x2f8] sm:$0xff]   ;;  %v3069_v31 = vld [vmem:[#allocation8 + $0x248] sm:$0xff]   ;;  %v818_v36 = vpack.c.bf16 %v3538_v57, %v3538_v57 }
 0x143   : > { %v3540_v58 = vpop.f32.mrf.mxu0  ;;  %v3546_v62 = vpop.f32.mrf.mxu1  ;;  %v1060_v53 = vmax.bf16 %v3297_v0, %v1044_v44 }
 0x144   : > { %2771 = vmatpush3.bf16.msra.mxu0 %v3022_v47  ;;  %2793 = vmatpush3.bf16.msra.mxu1 %v3023_v51  ;;  %v817_v40 = vpack.c.bf16 %v3540_v58, %v3540_v58  ;;  %v819_v41 = vpack.c.bf16 %v3546_v62, %v3546_v62  ;;  %v3044_v47 = vld [vmem:[#allocation8 + $0x180] sm:$0xff]   ;;  %v1058_v58 = vmax.bf16 %v3297_v0, %v1042_v45 }
 0x145   : > { %2772 = vmatprep.subr.bf16.mxu0 %v3024_v52  ;;  %v682_v2 = vpop.f32.mrf.mxu0  ;;  %2794 = vmatprep.subr.bf16.mxu1 %v3025_v56  ;;  %v723_v4 = vpop.f32.mrf.mxu1  ;;  %v3047_v56 = vld [vmem:[#allocation8 + $0x238] sm:$0xff]  }
 0x146   : > { %v1047_v51 = vadd.bf16 %v995_v29, %v817_v40  ;;  %v1049_v52 = vadd.bf16 %v1009_v43, %v819_v41  ;;  %v3051_v2 = vld [vmem:[#allocation8 + $0x230] sm:$0xff]   ;;  %v3053_v4 = vld [vmem:[#allocation8 + $0x268] sm:$0xff]   ;;  %v3073_v41 = vld [vmem:[#allocation8 + $0x240] sm:$0xff]  }
 0x147   : > { %v683_v6 = vpop.f32.mrf.mxu0  ;;  %v724_v9 = vpop.f32.mrf.mxu1  ;;  %v3072_v29 = vld [vmem:[#allocation8 + $0x288] sm:$0xff]   ;;  %v3074_v43 = vld [vmem:[#allocation8 + $0x2c0] sm:$0xff]  }
 0x148   : > { %2773 = vmatpush3.bf16.msra.mxu0 %v3026_v60  ;;  %2795 = vmatpush3.bf16.msra.mxu1 %v3027_v63  ;;  %v3049_v60 = vld [vmem:[#allocation8 + $0x270] sm:$0xff]   ;;  %v1063_v62 = vmax.bf16 %v3297_v0, %v1047_v51  ;;  %v1065_v63 = vmax.bf16 %v3297_v0, %v1049_v52  ;;  %v3058_v9 = vld [vmem:[#allocation8 + $0x2e0] sm:$0xff]   ;;  %v3077_v51 = vld [vmem:[#allocation8 + $0x378] sm:$0xff]  }
 0x149   : > { %2774 = vmatprep.subr.bf16.mxu0 %v3028_v1  ;;  %v3549_v11 = vpop.f32.mrf.mxu0  ;;  %2796 = vmatprep.subr.bf16.mxu1 %v3029_v3  ;;  %v3551_v13 = vpop.f32.mrf.mxu1  ;;  %v877_v1 = vcombine.high %v3528_v35, %v3528_v35  ;;  %v3052_v3 = vld [vmem:[#allocation8 + $0x2b0] sm:$0xff]   ;;  %v3057_v35 = vld [vmem:[#allocation8 + $0x260] sm:$0xff]   ;;  %v3078_v52 = vld [vmem:[#allocation8 + $0x3f8] sm:$0xff]  }
 0x14b   : > { %v3553_v15 = vpop.f32.mrf.mxu0  ;;  %v3555_v18 = vpop.f32.mrf.mxu1  ;;  %v3576_v6 = vrot.slane %v877_v1, %v3501_v42  ;;  %v3083_v1 = vld [vmem:[#allocation8 + $0x330] sm:$0xff]  }
 0x14c   : > { %2775 = vmatpush3.bf16.msra.mxu0 %v3031_v7  ;;  %2797 = vmatpush3.bf16.msra.mxu1 %v3032_v49  ;;  %v3055_v7 = vld [vmem:[#allocation8 + $0x228] sm:$0xff]   ;;  %v821_v44 = vpack.c.bf16 %v3553_v15, %v3553_v15 }
 0x14d   : > { %2776 = vmatprep.subr.bf16.mxu0 %v3033_v10  ;;  %v764_v22 = vpop.f32.mrf.mxu0  ;;  %2798 = vmatprep.subr.bf16.mxu1 %v3034_v12  ;;  %v805_v25 = vpop.f32.mrf.mxu1  ;;  %v893_v49 = vcombine.high %v3576_v6, %v3576_v6  ;;  %v3059_v10 = vld [vmem:[#allocation8 + $0x220] sm:$0xff]   ;;  %v900_v12 = vrot.slane %v3532_v46, %v3501_v42 }
 0x14e   : > { %v3064_v22 = vld [vmem:[#allocation8 + $0x298] sm:$0xff]  }
 0x14f   : > { %v765_v28 = vpop.f32.mrf.mxu0  ;;  %v806_v33 = vpop.f32.mrf.mxu1  ;;  %v921_v19 = vrot.slane %v893_v49, %v3501_v42  ;;  %v907_v49 = vrot.slane %v3576_v6, %v3501_v42  ;;  %v3101_v42 = vld [vmem:[#allocation8 + $0x390] sm:$0xff]   ;;  %v3102_v6 = vld [vmem:[#allocation8 + $0x348] sm:$0xff]  }
 0x150   : > { %2777 = vmatpush3.bf16.msra.mxu0 %v3035_v17  ;;  %2799 = vmatpush3.bf16.msra.mxu1 %v3036_v20  ;;  %v3062_v17 = vld [vmem:[#allocation8 + $0x2d8] sm:$0xff]   ;;  %v983_v28 = vpack.i.b16 %v900_v12, %v900_v12 }
 0x151   : > { %2778 = vmatprep.subr.bf16.mxu0 %v3037_v21  ;;  %2800 = vmatprep.subr.bf16.mxu1 %v3038_v23  ;;  %v3063_v20 = vld [vmem:[#allocation8 + $0x218] sm:$0xff]   ;;  %v922_v21 = vcombine.high %v900_v12, %v900_v12  ;;  %v3065_v23 = vld [vmem:[#allocation8 + $0x250] sm:$0xff]   ;;  %v925_v25 = vcombine.high %v921_v19, %v921_v19  ;;  %v1018_v33 = vpack.i.b16 %v921_v19, %v921_v19 }
 0x152   : > { %v988_v40 = vrot.slane %v983_v28, %v3511_v54  ;;  %v3094_v12 = vld [vmem:[#allocation8 + $0x358] sm:$0xff]   ;;  %v3104_v28 = vld [vmem:[#allocation8 + $0x308] sm:$0xff]  }
 0x153   : > { %v997_v46 = vpack.i.b16 %v922_v21, %v922_v21  ;;  %v1032_v34 = vpack.i.b16 %v925_v25, %v925_v25  ;;  %v1023_v57 = vrot.slane %v1018_v33, %v3511_v54  ;;  %v3097_v19 = vld [vmem:[#allocation8 + $0x398] sm:$0xff]   ;;  %v3099_v21 = vld [vmem:[#allocation8 + $0x3d0] sm:$0xff]   ;;  %v3103_v25 = vld [vmem:[#allocation8 + $0x3c8] sm:$0xff]  }
 0x154   : > { %2779 = vmatpush3.bf16.msra.mxu0 %v3039_v32  ;;  %2801 = vmatpush3.bf16.msra.mxu1 %v3040_v37  ;;  %v3070_v32 = vld [vmem:[#allocation8 + $0x2c8] sm:$0xff]   ;;  %v3106_v33 = vld [vmem:[#allocation8 + $0x340] sm:$0xff]  }
 0x155   : > { %2780 = vmatprep.subr.bf16.mxu0 %v3041_v38  ;;  %2802 = vmatprep.subr.bf16.mxu1 %v3042_v39  ;;  %v1002_v37 = vrot.slane %v997_v46, %v3511_v54  ;;  %v3071_v38 = vld [vmem:[#allocation8 + $0x208] sm:$0xff]   ;;  %v816_v39 = vpack.c.bf16 %v3536_v55, %v3536_v55  ;;  %v1037_v45 = vrot.slane %v1032_v34, %v3511_v54  ;;  %v3075_v55 = vld [vmem:[#allocation8 + $0x200] sm:$0xff]  }
 0x156   : > { %v822_v46 = vpack.c.bf16 %v3551_v13, %v3551_v13  ;;  %v3107_v34 = vld [vmem:[#allocation8 + $0x3c0] sm:$0xff]  }
 0x157   : > { %v3109_v13 = vld [vmem:[#allocation8 + $0x380] sm:$0xff]  }
 0x158   : > { %2781 = vmatpush3.bf16.msra.mxu0 %v3043_v26  ;;  %2803 = vmatpush3.bf16.msra.mxu1 %v3044_v47  ;;  %v823_v26 = vpack.c.bf16 %v3555_v18, %v3555_v18  ;;  %v1048_v47 = vadd.bf16 %v1002_v37, %v818_v36  ;;  %v3108_v37 = vld [vmem:[#allocation8 + $0x300] sm:$0xff]  }
 0x159   : > { %2810 = vmatprep.subr.bf16.mxu0 %v3045_v48  ;;  %2832 = vmatprep.subr.bf16.mxu1 %v3046_v50  ;;  %v1046_v48 = vadd.bf16 %v988_v40, %v816_v39  ;;  %v3076_v50 = vld [vmem:[#allocation8 + $0x280] sm:$0xff]  }
 0x15a   : > { %v1064_v15 = vmax.bf16 %v3297_v0, %v1048_v47 }
 0x15b   : > { %2214 = vmatmul.mubr.bf16.vlgmr.msra.gmra.mxu0 %v1058_v58  ;;  %2254 = vmatmul.mubr.bf16.vlgmr.msra.gmra.mxu1 %v1060_v53  ;;  %v1051_v53 = vadd.bf16 %v1023_v57, %v821_v44  ;;  %v3079_v58 = vld [vmem:[#allocation8 + $0x338] sm:$0xff]   ;;  %v1062_v18 = vmax.bf16 %v3297_v0, %v1046_v48 }
 0x15c   : > { %2811 = vmatpush3.bf16.msra.mxu0 %v3047_v56  ;;  %2833 = vmatpush3.bf16.msra.mxu1 %v3048_v59  ;;  %v1053_v56 = vadd.bf16 %v1037_v45, %v823_v26  ;;  %v3080_v59 = vld [vmem:[#allocation8 + $0x3b8] sm:$0xff]  }
 0x15d   : > { %2812 = vmatprep.subr.bf16.mxu0 %v3049_v60  ;;  %2834 = vmatprep.subr.bf16.mxu1 %v3050_v61  ;;  %v3081_v60 = vld [vmem:[#allocation8 + $0x370] sm:$0xff]  }
 0x15e   : > { %2293 = vmatprep.mubr.bf16.mxu0 %v1063_v62  ;;  %2333 = vmatprep.mubr.bf16.mxu1 %v1065_v63  ;;  %v3082_v61 = vld [vmem:[#allocation8 + $0x3f0] sm:$0xff]   ;;  %v1067_v62 = vmax.bf16 %v3297_v0, %v1051_v53  ;;  %v1069_v63 = vmax.bf16 %v3297_v0, %v1053_v56 }
 0x160   : > { %2813 = vmatpush3.bf16.msra.mxu0 %v3051_v2  ;;  %2835 = vmatpush3.bf16.msra.mxu1 %v3052_v3  ;;  %v3084_v2 = vld [vmem:[#allocation8 + $0x3b0] sm:$0xff]   ;;  %v3085_v3 = vld [vmem:[#allocation8 + $0x368] sm:$0xff]  }
 0x161   : > { %2814 = vmatprep.subr.bf16.mxu0 %v3053_v4  ;;  %2836 = vmatprep.subr.bf16.mxu1 %v3054_v5  ;;  %v3086_v4 = vld [vmem:[#allocation8 + $0x3e8] sm:$0xff]  }
 0x162   : > { %v3087_v5 = vld [vmem:[#allocation8 + $0x328] sm:$0xff]  }
 0x164   : > { %2815 = vmatpush3.bf16.msra.mxu0 %v3055_v7  ;;  %2837 = vmatpush3.bf16.msra.mxu1 %v3056_v8  ;;  %v3088_v7 = vld [vmem:[#allocation8 + $0x3a8] sm:$0xff]   ;;  %v3089_v8 = vld [vmem:[#allocation8 + $0x360] sm:$0xff]  }
 0x165   : > { %2816 = vmatprep.subr.bf16.mxu0 %v3057_v35  ;;  %2838 = vmatprep.subr.bf16.mxu1 %v3058_v9  ;;  %v3090_v35 = vld [vmem:[#allocation8 + $0x3e0] sm:$0xff]  }
 0x166   : > { %v3091_v9 = vld [vmem:[#allocation8 + $0x320] sm:$0xff]  }
 0x168   : > { %2817 = vmatpush3.bf16.msra.mxu0 %v3059_v10  ;;  %2839 = vmatpush3.bf16.msra.mxu1 %v3060_v14  ;;  %v3092_v10 = vld [vmem:[#allocation8 + $0x3a0] sm:$0xff]   ;;  %v3095_v14 = vld [vmem:[#allocation8 + $0x3d8] sm:$0xff]  }
 0x169   : > { %2818 = vmatprep.subr.bf16.mxu0 %v3061_v16  ;;  %2840 = vmatprep.subr.bf16.mxu1 %v3062_v17  ;;  %v3096_v16 = vld [vmem:[#allocation8 + $0x318] sm:$0xff]   ;;  %v923_v17 = vcombine.high %v907_v49, %v907_v49 }
 0x16c   : > { %2819 = vmatpush3.bf16.msra.mxu0 %v3063_v20  ;;  %2841 = vmatpush3.bf16.msra.mxu1 %v3064_v22  ;;  %v3098_v20 = vld [vmem:[#allocation8 + $0x350] sm:$0xff]   ;;  %v1025_v22 = vpack.i.b16 %v923_v17, %v923_v17 }
 0x16d   : > { %2820 = vmatprep.subr.bf16.mxu0 %v3065_v23  ;;  %2842 = vmatprep.subr.bf16.mxu1 %v3066_v24  ;;  %v3100_v23 = vld [vmem:[#allocation8 + $0x310] sm:$0xff]   ;;  %v1011_v24 = vpack.i.b16 %v907_v49, %v907_v49 }
 0x170   : > { %2821 = vmatpush3.bf16.msra.mxu0 %v3067_v27  ;;  %2843 = vmatpush3.bf16.msra.mxu1 %v3068_v30  ;;  %v1030_v27 = vrot.slane %v1025_v22, %v3511_v54  ;;  %v820_v30 = vpack.c.bf16 %v3549_v11, %v3549_v11 }
 0x171   : > { %2822 = vmatprep.subr.bf16.mxu0 %v3069_v31  ;;  %2844 = vmatprep.subr.bf16.mxu1 %v3070_v32  ;;  %v1016_v31 = vrot.slane %v1011_v24, %v3511_v54  ;;  %v3105_v32 = vld [vmem:[#allocation8 + $0x388] sm:$0xff]  }
 0x172   : > { %v1052_v36 = vadd.bf16 %v1030_v27, %v822_v46 }
 0x174   : > { %2823 = vmatpush3.bf16.msra.mxu0 %v3071_v38  ;;  %2845 = vmatpush3.bf16.msra.mxu1 %v3072_v29  ;;  %v1050_v38 = vadd.bf16 %v1016_v31, %v820_v30  ;;  %v1068_v39 = vmax.bf16 %v3297_v0, %v1052_v36  ;;  %v2589_v29 = vld [vmem:[%s3652_s4] ss:$0 sm:$0xff] }
 0x175   : > { %2824 = vmatprep.subr.bf16.mxu0 %v3073_v41  ;;  %2846 = vmatprep.subr.bf16.mxu1 %v3074_v43 }
 0x176   : > { %v1066_v11 = vmax.bf16 %v3297_v0, %v1050_v38 }
 0x178   : > { %2825 = vmatpush3.bf16.msra.mxu0 %v3075_v55  ;;  %2847 = vmatpush3.bf16.msra.mxu1 %v3076_v50 }
 0x179   : > { %2854 = vmatprep.subr.bf16.mxu0 %v3077_v51  ;;  %2876 = vmatprep.subr.bf16.mxu1 %v3078_v52 }
 0x17b   : > { %2294 = vmatmul.mubr.bf16.vlgmr.msra.gmra.mxu0 %v1062_v18  ;;  %2334 = vmatmul.mubr.bf16.vlgmr.msra.gmra.mxu1 %v1064_v15 }
 0x17c   : > { %2855 = vmatpush3.bf16.msra.mxu0 %v3079_v58  ;;  %2877 = vmatpush3.bf16.msra.mxu1 %v3080_v59 }
 0x17d   : > { %2856 = vmatprep.subr.bf16.mxu0 %v3081_v60  ;;  %2878 = vmatprep.subr.bf16.mxu1 %v3082_v61 }
 0x17e   : > { %2373 = vmatprep.mubr.bf16.mxu0 %v1067_v62  ;;  %2413 = vmatprep.mubr.bf16.mxu1 %v1069_v63 }
 0x180   : > { %2857 = vmatpush3.bf16.msra.mxu0 %v3083_v1  ;;  %2879 = vmatpush3.bf16.msra.mxu1 %v3084_v2 }
 0x181   : > { %2858 = vmatprep.subr.bf16.mxu0 %v3085_v3  ;;  %2880 = vmatprep.subr.bf16.mxu1 %v3086_v4 }
 0x184   : > { %2859 = vmatpush3.bf16.msra.mxu0 %v3087_v5  ;;  %2881 = vmatpush3.bf16.msra.mxu1 %v3088_v7 }
 0x185   : > { %2860 = vmatprep.subr.bf16.mxu0 %v3089_v8  ;;  %2882 = vmatprep.subr.bf16.mxu1 %v3090_v35 }
 0x188   : > { %2861 = vmatpush3.bf16.msra.mxu0 %v3091_v9  ;;  %2883 = vmatpush3.bf16.msra.mxu1 %v3092_v10 }
 0x189   : > { %2862 = vmatprep.subr.bf16.mxu0 %v3094_v12  ;;  %2884 = vmatprep.subr.bf16.mxu1 %v3095_v14 }
 0x18c   : > { %2863 = vmatpush3.bf16.msra.mxu0 %v3096_v16  ;;  %2885 = vmatpush3.bf16.msra.mxu1 %v3097_v19 }
 0x18d   : > { %2864 = vmatprep.subr.bf16.mxu0 %v3098_v20  ;;  %2886 = vmatprep.subr.bf16.mxu1 %v3099_v21 }
 0x190   : > { %2865 = vmatpush3.bf16.msra.mxu0 %v3100_v23  ;;  %2887 = vmatpush3.bf16.msra.mxu1 %v3101_v42 }
 0x191   : > { %2866 = vmatprep.subr.bf16.mxu0 %v3102_v6  ;;  %2888 = vmatprep.subr.bf16.mxu1 %v3103_v25 }
 0x194   : > { %2867 = vmatpush3.bf16.msra.mxu0 %v3104_v28  ;;  %2889 = vmatpush3.bf16.msra.mxu1 %v3105_v32 }
 0x195   : > { %2868 = vmatprep.subr.bf16.mxu0 %v3106_v33  ;;  %2890 = vmatprep.subr.bf16.mxu1 %v3107_v34 }
 0x198   : > { %2869 = vmatpush3.bf16.msra.mxu0 %v3108_v37  ;;  %2891 = vmatpush3.bf16.msra.mxu1 %v3109_v13 }
 0x19b   : > { %2374 = vmatmul.mubr.bf16.vlgmr.msra.gmra.mxu0 %v1066_v11  ;;  %2414 = vmatmul.mubr.bf16.vlgmr.msra.gmra.mxu1 %v1068_v39 }
 0x1fb   : > { %v2738_v54 = vpop.f32.mrf.mxu0  ;;  %v2760_v40 = vpop.f32.mrf.mxu1 }
 0x1fd   : > { %v2739_v41 = vpop.f32.mrf.mxu0  ;;  %v2761_v44 = vpop.f32.mrf.mxu1 }
 0x1fe   : > { %v2740_v43 = vadd.f32 %v2739_v41, %v2738_v54  ;;  %v2762_v57 = vadd.f32 %v2761_v44, %v2760_v40 }
 0x1ff   : > { %v2741_v26 = vpop.f32.mrf.mxu0  ;;  %v2763_v47 = vpop.f32.mrf.mxu1 }
 0x200   : > { %v2136_v45 = vadd.f32 %v2740_v43, %v2589_v29 }
 0x201   : > { %v2742_v55 = vpop.f32.mrf.mxu0  ;;  %v2764_v50 = vpop.f32.mrf.mxu1 }
 0x202   : > { %v2176_v48 = vadd.f32 %v2762_v57, %v2136_v45 }
 0x21b   : > { %v2782_v0 = vpop.f32.mrf.mxu0  ;;  %v2804_v51 = vpop.f32.mrf.mxu1 }
 0x21d   : > { %v2783_v52 = vpop.f32.mrf.mxu0  ;;  %v2805_v53 = vpop.f32.mrf.mxu1 }
 0x21e   : > { %v2784_v4 = vadd.f32 %v2783_v52, %v2782_v0  ;;  %v2806_v7 = vadd.f32 %v2805_v53, %v2804_v51 }
 0x21f   : > { %v2785_v56 = vpop.f32.mrf.mxu0  ;;  %v2807_v15 = vpop.f32.mrf.mxu1 }
 0x220   : > { %v2216_v5 = vadd.f32 %v2784_v4, %v2176_v48 }
 0x221   : > { %v2786_v58 = vpop.f32.mrf.mxu0  ;;  %v2808_v18 = vpop.f32.mrf.mxu1 }
 0x222   : > { %v2256_v35 = vadd.f32 %v2806_v7, %v2216_v5 }
 0x23b   : > { %v2826_v59 = vpop.f32.mrf.mxu0  ;;  %v2848_v60 = vpop.f32.mrf.mxu1 }
 0x23d   : > { %v2827_v61 = vpop.f32.mrf.mxu0  ;;  %v2849_v62 = vpop.f32.mrf.mxu1 }
 0x23e   : > { %v2828_v8 = vadd.f32 %v2827_v61, %v2826_v59  ;;  %v2850_v10 = vadd.f32 %v2849_v62, %v2848_v60 }
 0x23f   : > { %v2829_v63 = vpop.f32.mrf.mxu0  ;;  %v2851_v1 = vpop.f32.mrf.mxu1 }
 0x240   : > { %v2296_v9 = vadd.f32 %v2828_v8, %v2256_v35 }
 0x241   : > { %v2830_v2 = vpop.f32.mrf.mxu0  ;;  %v2852_v3 = vpop.f32.mrf.mxu1 }
 0x242   : > { %v2336_v16 = vadd.f32 %v2850_v10, %v2296_v9 }
 0x25b   : > { %v2870_v49 = vpop.f32.mrf.mxu0  ;;  %v2892_v12 = vpop.f32.mrf.mxu1 }
 0x25d   : > { %v2871_v14 = vpop.f32.mrf.mxu0  ;;  %v2893_v19 = vpop.f32.mrf.mxu1 }
 0x25e   : > { %v2872_v17 = vadd.f32 %v2871_v14, %v2870_v49  ;;  %v2894_v22 = vadd.f32 %v2893_v19, %v2892_v12 }
 0x25f   : > { %v2873_v20 = vpop.f32.mrf.mxu0  ;;  %v2895_v23 = vpop.f32.mrf.mxu1 }
 0x260   : > { %v2376_v21 = vadd.f32 %v2872_v17, %v2336_v16 }
 0x261   : > { %v2874_v24 = vpop.f32.mrf.mxu0  ;;  %v2896_v6 = vpop.f32.mrf.mxu1 }
 0x262   : > { %v2416_v42 = vadd.f32 %v2894_v22, %v2376_v21 }
 0x264   : > { %2421 = vst [vmem:[%s281_s17] sm:$0xff] %v2416_v42 }
 0x265   : > { %3229 = shalt.err (!%p3226_p9)
}
 0x266   : > { %s3230_s6 = scalar_lea.hbm %s2434_s11, 128  ;;  %s3234_s24 = scalar_lea.hbm %s3653_s5, 256 }
 0x267   : > { %p3231_p13 = scmp.ne.s32.totalorder %s2434_s11, %s3230_s6  ;;  %p3235_p3 = scmp.lt.s32.totalorder %s2434_s11, %s3653_s5 }
 0x268   : > { %p3236_p11 = scmp.lt.s32.totalorder %s3234_s24, %s3230_s6 }
 0x269   : > { %p3232_p1 = pnand %p3231_p13, %p3671_p6 }
 0x26a   : > { %p3237_p2 = por %p3236_p11, %p3235_p3 }
 0x26b   : > { %p3233_p8 = pneg %p3232_p1 }
 0x26d   : > { %p3238_p4 = pnand %p3237_p2, %p3233_p8 }
 0x26f   : > { %3241 = shalt.err (!%p3238_p4)
}
 0x270   : > { %2912 = dma.vmem_to_hbm [thread:$0]  (%p3671_p6), %s2437_s23, 128, %s2434_s11, %s2423_s10  }
 0x271 PF: > { %s2448_s16 = sand.u32 1, %s3276_s18   ;;  %p3672_p12 = scmp.ne.s32.totalorder %s3659_s25, 0 }
 0x272   : > { %p3673_p0 = scmp.ge.s32.totalorder %s3288_s21, 2  ;;  %s2449_s17 = scalar_lea.sflag [#allocation4], %s2448_s16 }
 0x274   : > { %p2929_p5 = pnand %p3673_p0, %p3672_p12 }
 0x276   : > { %p2930_p10 = pneg %p2929_p5 }
 0x278   : > { %3271 = dma.done.wait (%p2930_p10), %s2449_s17, 128  }
 0x279   : > { %3273 = vsyncadd (%p2930_p10), %s2449_s17, 4294967168  ;;  %p20_p7 = scmp.ge.s32.totalorder %s3410_s30, 4   ;;  %s3674_s18 = smov %s3280_s19 }
 0x27a   : > { %s3675_s19 = smov %s3284_s20  ;;  %s3676_s20 = smov %s3419_s7 }
 0x27b   : > { %s3677_s21 = smov %s3410_s30  ;;  %22 = sbr.rel (!%p20_p7) target bundleno = 7 (0x7), region = 97 }
 0x280   :  { %2454 = vsyncpa [#allocation3], 1 }
 0x281   :  { %2456 = vsyncpa [#allocation3 + $0x1], 1 }
 0x282   :  { %2457 = vsyncpa [#allocation6], 1 }
 0x283   :  { %2458 = vsyncpa [#allocation9], 1 }
 0x284   :  { %2459 = vsyncpa [#allocation4], 1 }
 0x285   :  { %2461 = vsyncpa [#allocation4 + $0x1], 1 }

</bundles_post_ra>
